<compile_context>
chip_gen: v7x
topology: tpu7x:2x2x1
jax: 0.10.0
libtpu: 0.0.40
codegen_flags: <defaults>
</compile_context>

<pallas_src>
import functools

import jax
import jax.numpy as jnp
from jax.experimental import pallas as pl
from jax.experimental.pallas import tpu as pltpu

# Conservative tile budget (fits v7x's 64 MiB physical VMEM with headroom;
# v5e/v6e have 128 MiB).  Scoped limit handed to Mosaic explicitly.
_VMEM_TILE_BUDGET = 32 * 1024 * 1024
_VMEM_LIMIT_BYTES = 48 * 1024 * 1024


def _round_up(x, m):
    return (x + m - 1) // m * m


def _pick_tile(total, align, max_tile):
    """Largest divisor of `total` that is a multiple of `align` and <= max_tile."""
    best = align
    t = align
    stop = min(total, max_tile)
    while t <= stop:
        if total % t == 0:
            best = t
        t += align
    return best


def _sublane_multiple(dtype):
    # f32 -> 8 sublanes, bf16 -> 16, int8/fp8 -> 32 (sub-32-bit packs along sublanes).
    return {4: 8, 2: 16, 1: 32}.get(jnp.dtype(dtype).itemsize, 8)


def _apply_activation(out, activation):
    if activation == "relu":
        return jnp.maximum(out, 0.0)
    if activation == "lrelu":
        return jnp.where(out >= 0.0, out, 0.2 * out)
    if activation == "tanh":
        return jnp.tanh(out)
    if activation == "selu":
        alpha = 1.6732632423543772
        scale = 1.0507009873554805
        return scale * jnp.where(out > 0.0, out, alpha * (jnp.exp(out) - 1.0))
    if activation == "none":
        return out
    raise ValueError(f"unsupported activation: {activation}")


def _linear_block_kernel_fused(x_ref, w_ref, b_ref, o_ref, *, activation):
    """Single-K path: out tile = act(x_tile @ w_tile + b_tile), no accumulator."""
    out = jnp.dot(x_ref[...], w_ref[...], preferred_element_type=jnp.float32)
    out = out + b_ref[...].astype(jnp.float32)
    o_ref[...] = _apply_activation(out, activation).astype(o_ref.dtype)


def _linear_block_kernel_acc(x_ref, w_ref, b_ref, o_ref, acc_ref, *, activation):
    """K-streamed path: partial matmuls accumulate in f32 scratch; finalize last."""
    k = pl.program_id(2)

    @pl.when(k == 0)
    def _():
        acc_ref[...] = jnp.zeros_like(acc_ref)

    acc_ref[...] += jnp.dot(x_ref[...], w_ref[...],
                            preferred_element_type=jnp.float32)

    @pl.when(k == pl.num_programs(2) - 1)
    def _():
        out = acc_ref[...] + b_ref[...].astype(jnp.float32)
        o_ref[...] = _apply_activation(out, activation).astype(o_ref.dtype)


def linear_block_forward(x, w, b, *, activation="relu", compute_dtype=None,
                         max_block_b=512, max_block_n=2048, max_block_k=2048,
                         _force_stream_k=False):
    """LinearBlock forward: activation(x @ w + b).

    x: (B, ...) flattened to (B, input_dim)
    w: (input_dim, output_dim)   (transposed vs. PyTorch nn.Linear.weight)
    b: (output_dim,)
    compute_dtype: optional MXU operand dtype (e.g. jnp.bfloat16); accumulation
                   stays f32 and the output keeps x's original dtype.
    """
    B = x.shape[0]
    x2d = x.reshape(B, -1)
    K = x2d.shape[1]
    Kw, N = w.shape
    assert Kw == K, (w.shape, K)
    assert b.shape == (N,), b.shape

    out_dtype = x2d.dtype
    if compute_dtype is not None:
        x2d = x2d.astype(compute_dtype)
        w = w.astype(compute_dtype)
    elif w.dtype != x2d.dtype:
        # MXU operands must agree; cast weights to the activation dtype.
        w = w.astype(x2d.dtype)

    xb = jnp.dtype(x2d.dtype).itemsize
    wb = jnp.dtype(w.dtype).itemsize
    ob = jnp.dtype(out_dtype).itemsize

    sub = _sublane_multiple(x2d.dtype)
    b_pad = _round_up(B, sub)
    k_pad = _round_up(K, 128)
    n_pad = _round_up(N, 128)          # lane-dense (unmasked) output stores

    tb = _pick_tile(b_pad, sub, max_block_b)
    tn = _pick_tile(n_pad, 128, max_block_n)

    # Decide whether the whole K reduction fits one resident tile (double-buffered
    # x / W / out + bias).  True for MUNIT-sized layers -> no accumulator, no K axis.
    single_k_bytes = (2 * tb * k_pad * xb + 2 * k_pad * tn * wb
                      + 2 * tn * 4 + 2 * tb * tn * ob)
    single_k = (single_k_bytes <= _VMEM_TILE_BUDGET) and not _force_stream_k

    if single_k:
        tk = k_pad
    else:
        fixed = 2 * tb * tn * ob + tb * tn * 4 + 2 * tn * 4
        per_tk = 2 * tb * xb + 2 * tn * wb
        max_tk_budget = max(128, (_VMEM_TILE_BUDGET - fixed) // per_tk)
        tk = _pick_tile(k_pad, 128, min(max_block_k, max_tk_budget))

    # Pad only when actually needed (aligned shapes pass straight through).
    if (b_pad, k_pad) != (B, K):
        xp = jnp.zeros((b_pad, k_pad), x2d.dtype).at[:B, :K].set(x2d)
    else:
        xp = x2d
    if (k_pad, n_pad) != (K, N):
        wp = jnp.zeros((k_pad, n_pad), w.dtype).at[:K, :N].set(w)
    else:
        wp = w
    b2d = b.reshape(1, N)
    if n_pad != N:
        bp = jnp.zeros((1, n_pad), b.dtype).at[:, :N].set(b2d)
    else:
        bp = b2d

    nb, nn, nk = b_pad // tb, n_pad // tn, k_pad // tk

    cost = pl.CostEstimate(
        flops=2 * B * K * N,
        transcendentals=(B * N if activation in ("tanh", "selu") else 0),
        bytes_accessed=(B * K * xb + K * N * wb
                        + N * jnp.dtype(b.dtype).itemsize + B * N * ob))

    if single_k:
        kernel = functools.partial(_linear_block_kernel_fused, activation=activation)
        out = pl.pallas_call(
            kernel,
            out_shape=jax.ShapeDtypeStruct((b_pad, n_pad), out_dtype),
            grid_spec=pltpu.PrefetchScalarGridSpec(
                num_scalar_prefetch=0,
                grid=(nb, nn),
                in_specs=[
                    pl.BlockSpec((tb, k_pad), lambda i, j: (i, 0)),   # x batch tile
                    pl.BlockSpec((k_pad, tn), lambda i, j: (0, j)),   # W: resident per N tile
                    pl.BlockSpec((1, tn), lambda i, j: (0, j)),       # bias
                ],
                out_specs=pl.BlockSpec((tb, tn), lambda i, j: (i, j)),
            ),
            compiler_params=pltpu.CompilerParams(
                dimension_semantics=("parallel", "parallel"),
                vmem_limit_bytes=_VMEM_LIMIT_BYTES),
            cost_estimate=cost,
        )(xp, wp, bp)
    else:
        kernel = functools.partial(_linear_block_kernel_acc, activation=activation)
        out = pl.pallas_call(
            kernel,
            out_shape=jax.ShapeDtypeStruct((b_pad, n_pad), out_dtype),
            grid_spec=pltpu.PrefetchScalarGridSpec(
                num_scalar_prefetch=0,
                grid=(nb, nn, nk),
                in_specs=[
                    pl.BlockSpec((tb, tk), lambda i, j, k: (i, k)),
                    pl.BlockSpec((tk, tn), lambda i, j, k: (k, j)),
                    pl.BlockSpec((1, tn), lambda i, j, k: (0, j)),
                ],
                out_specs=pl.BlockSpec((tb, tn), lambda i, j, k: (i, j)),
                scratch_shapes=[pltpu.VMEM((tb, tn), jnp.float32)],
            ),
            compiler_params=pltpu.CompilerParams(
                dimension_semantics=("parallel", "parallel", "arbitrary"),
                vmem_limit_bytes=_VMEM_LIMIT_BYTES),
            cost_estimate=cost,
        )(xp, wp, bp)

    if (b_pad, n_pad) != (B, N):
        out = out[:B, :N]
    return out


def init_params(key, input_dim, output_dim, dtype=jnp.float32):
    """Deterministic init mimicking nn.Linear default U(-1/sqrt(fan_in), +)."""
    k1, k2 = jax.random.split(key, 2)
    bound = 1.0 / jnp.sqrt(input_dim)
    # Stored transposed: (in_features, out_features)
    w = jax.random.uniform(k1, (input_dim, output_dim), dtype, -bound, bound)
    b = jax.random.uniform(k2, (output_dim,), dtype, -bound, bound)
    return w, b


if __name__ == "__main__":
    key = jax.random.PRNGKey(0)
    kx, kp = jax.random.split(key)

    # LinearBlock(input_dim=C*H*W, output_dim=32, norm='none', activation='relu')
    B, C, H, W = 2, 4, 16, 16
    input_dim = C * H * W        # 1024
    output_dim = 32

    x = jax.random.normal(kx, (B, C, H, W), jnp.float32)
    w, b = init_params(kp, input_dim, output_dim)

    # Reference in plain JAX (same math as the PyTorch module).
    x2d = x.reshape(B, -1)
    ref = jnp.maximum(x2d @ w + b, 0.0)

    # Fast path (single-K, fused kernel).
    y = linear_block_forward(x, w, b, activation="relu")
    jax.block_until_ready(y)
    assert y.shape == (B, output_dim), y.shape
    assert jnp.allclose(y, ref, atol=1e-4, rtol=1e-5)

    # K-streamed fallback path (exercised explicitly at small shape).
    y2 = linear_block_forward(x, w, b, activation="relu",
                              max_block_k=512, _force_stream_k=True)
    jax.block_until_ready(y2)
    assert jnp.allclose(y2, ref, atol=1e-4, rtol=1e-5)

    print("KERNEL_OK")
</pallas_src>

<mosaic_0001>
module attributes {stable_mosaic.version = 11 : i64} {
  func.func @_linear_block_kernel_fused(%arg0: i32, %arg1: i32, %arg2: memref<8x1024xf32, #tpu.memory_space<vmem>>, %arg3: memref<1024x128xf32, #tpu.memory_space<vmem>>, %arg4: memref<1x128xf32, #tpu.memory_space<vmem>>, %arg5: memref<8x128xf32, #tpu.memory_space<vmem>>) attributes {dimension_semantics = [#tpu.dimension_semantics<parallel>, #tpu.dimension_semantics<parallel>], iteration_bounds = array<i64: 1, 1>, scalar_prefetch = 0 : i64, scratch_operands = 0 : i64, tpu.core_type = #tpu.core_type<tc>, window_params = [{transform_indices = @transform_0, window_bounds = array<i64: 8, 1024>}, {transform_indices = @transform_1, window_bounds = array<i64: 1024, 128>}, {transform_indices = @transform_2, window_bounds = array<i64: 1, 128>}, {transform_indices = @transform_3, window_bounds = array<i64: 8, 128>}]} {
    %c0 = arith.constant 0 : index
    %c0_0 = arith.constant 0 : index
    %0 = vector.load %arg2[%c0, %c0_0] : memref<8x1024xf32, #tpu.memory_space<vmem>>, vector<8x1024xf32>
    %c0_1 = arith.constant 0 : index
    %c0_2 = arith.constant 0 : index
    %1 = vector.load %arg3[%c0_1, %c0_2] : memref<1024x128xf32, #tpu.memory_space<vmem>>, vector<1024x128xf32>
    %cst = arith.constant dense<0.000000e+00> : vector<8x128xf32>
    %2 = tpu.matmul %0, %1, %cst {dimension_numbers = #tpu.dot_dimension_numbers<[1], [0], [0], [1], [0, 0, 1, 1], [], []>} : vector<8x1024xf32>, vector<1024x128xf32>, vector<8x128xf32> -> vector<8x128xf32>
    %c0_3 = arith.constant 0 : index
    %c0_4 = arith.constant 0 : index
    %3 = vector.load %arg4[%c0_3, %c0_4] : memref<1x128xf32, #tpu.memory_space<vmem>>, vector<1x128xf32>
    %4 = vector.broadcast %3 : vector<1x128xf32> to vector<8x128xf32>
    %5 = arith.addf %2, %4 : vector<8x128xf32>
    %cst_5 = arith.constant 0.000000e+00 : f32
    %6 = vector.broadcast %cst_5 : f32 to vector<8x128xf32>
    %7 = arith.maximumf %5, %6 : vector<8x128xf32>
    %c0_6 = arith.constant 0 : index
    %c0_7 = arith.constant 0 : index
    %8 = vector.load %arg5[%c0_6, %c0_7] : memref<8x128xf32, #tpu.memory_space<vmem>>, vector<8x128xf32>
    tpu.vector_store %arg5[%c0_6, %c0_7], %7 {strides = array<i32>} : memref<8x128xf32, #tpu.memory_space<vmem>>, vector<8x128xf32>,
    return
  }
  func.func @transform_0(%arg0: i32, %arg1: i32) -> (i32, i32) {
    %c0_i32 = arith.constant 0 : i32
    %c0_i32_0 = arith.constant 0 : i32
    return %arg0, %c0_i32 : i32, i32
  }
  func.func @transform_1(%arg0: i32, %arg1: i32) -> (i32, i32) {
    %c0_i32 = arith.constant 0 : i32
    %c0_i32_0 = arith.constant 0 : i32
    return %c0_i32, %arg1 : i32, i32
  }
  func.func @transform_2(%arg0: i32, %arg1: i32) -> (i32, i32) {
    %c0_i32 = arith.constant 0 : i32
    %c0_i32_0 = arith.constant 0 : i32
    return %c0_i32, %arg1 : i32, i32
  }
  func.func @transform_3(%arg0: i32, %arg1: i32) -> (i32, i32) {
    %c0_i32 = arith.constant 0 : i32
    return %arg0, %arg1 : i32, i32
  }
}

</mosaic_0001>

<bundles_post_ra>
// kernel: tpu_custom_call.1
= control target key start
LH: loop header
LB: loop body
LE: loop exit
PB: predicated region body
PF: predicated region fallthrough
CT: control target
= control target key end

     0   :  { %8 = vsyncpa [#allocation3], 0  ;;  %s899_s0 = inlined_call_operand.hbm [shape: f32[8,1024], index: 0, kind: input, shape index: {}]   ;;  %s900_s1 = inlined_call_operand.hbm [shape: f32[1024,128], index: 1, kind: input, shape index: {}]   ;;  %s901_s2 = inlined_call_operand.vmem [shape: f32[1,128], index: 2, kind: input, shape index: {}]   ;;  %s902_s3 = inlined_call_operand.hbm [shape: f32[8,128], index: 3, kind: output, shape index: {}]  }
   0x1   :  { %9 = vsyncpa [#allocation6], 0 }
   0x2   :  { %10 = vsyncpa [#allocation4], 0  ;;  %s828_s12 = smov [#allocation2]   ;;  %s829_s14 = smov [#allocation5]  }
   0x3   :  { %s17_s13 = sshll.u32 %s828_s12, 4  ;;  %s26_s15 = sshll.u32 %s829_s14, 4  ;;  %s18_s13 = int_to_ptr.vmem [resolvable:$true] %s17_s13  ;;  %s853_s15 = int_to_ptr.vmem [resolvable:$true] %s26_s15 }
   0x4   :  { %s756_s18 = scalar_lea.hbm %s899_s0, 1024 }
   0x5   :  { %p757_p0 = scmp.ne.s32.totalorder %s899_s0, %s756_s18  ;;  %p760_p1 = scmp.lt.u32.totalorder %s756_s18, %s899_s0 }
   0x7   :  { %p762_p2 = pnand %p760_p1, %p757_p0 }
   0x9   :  { %765 = shalt.err (!%p762_p2)
}
   0xa   :  { %s766_s23 = scalar_lea.vmem %s18_s13, 1024  ;;  %p771_p4 = scmp.lt.s32.totalorder %s18_s13, %s18_s13 }
   0xb   :  { %p767_p3 = scmp.ne.s32.totalorder %s18_s13, %s766_s23  ;;  %p772_p5 = scmp.lt.s32.totalorder %s766_s23, %s766_s23 }
   0xd   :  { %p773_p6 = por %p772_p5, %p771_p4 }
   0xf   :  { %p774_p7 = pnand %p773_p6, %p767_p3 }
  0x11   :  { %777 = shalt.err (!%p774_p7)
}
  0x12   :  { %20 = dma.hbm_to_vmem [thread:$0]  %s899_s0, 1024, %s18_s13, [#allocation3]  }
  0x13   :  { %s778_s28 = scalar_lea.hbm %s900_s1, 16384 }
  0x14   :  { %p779_p8 = scmp.ne.s32.totalorder %s900_s1, %s778_s28  ;;  %p782_p9 = scmp.lt.u32.totalorder %s778_s28, %s900_s1 }
  0x16   :  { %p784_p10 = pnand %p782_p9, %p779_p8 }
  0x18   :  { %787 = shalt.err (!%p784_p10)
}
  0x19   :  { %s788_s6 = scalar_lea.vmem %s853_s15, 16384  ;;  %p793_p12 = scmp.lt.s32.totalorder %s853_s15, %s853_s15 }
  0x1a   :  { %p789_p11 = scmp.ne.s32.totalorder %s853_s15, %s788_s6  ;;  %p794_p13 = scmp.lt.s32.totalorder %s788_s6, %s788_s6 }
  0x1c   :  { %p795_p0 = por %p794_p13, %p793_p12 }
  0x1e   :  { %p796_p1 = pnand %p795_p0, %p789_p11 }
  0x20   :  { %799 = shalt.err (!%p796_p1)
}
  0x21   :  { %s830_s0 = smov 128   ;;  %s831_s7 = smov 8  }
  0x22   :  { %32 = dma.hbm_to_vmem [thread:$0]  %s900_s1, 16384, %s853_s15, [#allocation6], %s830_s0, %s830_s0, %s831_s7  }
  0x23   :  { %822 = dma.done.wait [#allocation3], 1024  }
  0x24   :  { %823 = vsyncadd [#allocation3], 4294966272 }
  0x25   :  { %824 = dma.done.wait [#allocation6], 16384  }
  0x26   :  { %825 = vsyncadd [#allocation6], 4294950912  ;;  %v65_v0 = vld [vmem:[#allocation5 + $0x80] sm:$0xff]  ;;  %v66_v1 = vld [vmem:[#allocation5 + $0x88] sm:$0xff]  ;;  %s832_s11 = smov [#allocation7]  }
  0x27   :  { %v49_v2 = vld [vmem:[#allocation5] sm:$0xff]  ;;  %v623_v3 = vpack.c.bf16 %v66_v1, %v65_v0  ;;  %v50_v4 = vld [vmem:[#allocation5 + $0x8] sm:$0xff]  ;;  %v67_v11 = vld [vmem:[#allocation5 + $0x90] sm:$0xff]  ;;  %s472_s12 = sshll.u32 %s832_s11, 4  ;;  %s473_s12 = int_to_ptr.vmem [resolvable:$true] %s472_s12 }
  0x28   :  { %v97_v5 = vld [vmem:[#allocation5 + $0x180] sm:$0xff]  ;;  %v98_v6 = vld [vmem:[#allocation5 + $0x188] sm:$0xff]  ;;  %v625_v7 = vpack.c.bf16 %v50_v4, %v49_v2  ;;  %v68_v13 = vld [vmem:[#allocation5 + $0x98] sm:$0xff]  ;;  %p805_p3 = scmp.lt.s32.totalorder %s473_s12, %s473_s12 }
  0x29   :  { %v655_v8 = vpack.c.bf16 %v98_v6, %v97_v5  ;;  %v81_v9 = vld [vmem:[#allocation5 + $0x100] sm:$0xff]  ;;  %v82_v10 = vld [vmem:[#allocation5 + $0x108] sm:$0xff]  ;;  %624 = vmatprep.subr.bf16.mxu0 %v623_v3  ;;  %v51_v14 = vld [vmem:[#allocation5 + $0x10] sm:$0xff]  ;;  %v627_v16 = vpack.c.bf16 %v68_v13, %v67_v11 }
  0x2a   :  { %v657_v12 = vpack.c.bf16 %v82_v10, %v81_v9  ;;  %v52_v15 = vld [vmem:[#allocation5 + $0x18] sm:$0xff]  ;;  %626 = vmatpush3.bf16.msra.mxu0 %v625_v7  ;;  %v99_v18 = vld [vmem:[#allocation5 + $0x190] sm:$0xff]  ;;  %v69_v23 = vld [vmem:[#allocation5 + $0xa0] sm:$0xff] }
  0x2b   :  { %656 = vmatprep.subr.bf16.mxu1 %v655_v8  ;;  %v629_v17 = vpack.c.bf16 %v52_v15, %v51_v14  ;;  %v100_v19 = vld [vmem:[#allocation5 + $0x198] sm:$0xff]  ;;  %v83_v20 = vld [vmem:[#allocation5 + $0x110] sm:$0xff]  ;;  %v70_v24 = vld [vmem:[#allocation5 + $0xa8] sm:$0xff]  ;;  %628 = vmatprep.subr.bf16.mxu0 %v627_v16 }
  0x2c   :  { %658 = vmatpush3.bf16.msra.mxu1 %v657_v12  ;;  %v659_v21 = vpack.c.bf16 %v100_v19, %v99_v18  ;;  %v84_v22 = vld [vmem:[#allocation5 + $0x118] sm:$0xff]  ;;  %v631_v26 = vpack.c.bf16 %v70_v24, %v69_v23  ;;  %v53_v27 = vld [vmem:[#allocation5 + $0x20] sm:$0xff]  ;;  %v54_v28 = vld [vmem:[#allocation5 + $0x28] sm:$0xff] }
  0x2d   :  { %v661_v25 = vpack.c.bf16 %v84_v22, %v83_v20  ;;  %v101_v29 = vld [vmem:[#allocation5 + $0x1a0] sm:$0xff]  ;;  %v102_v30 = vld [vmem:[#allocation5 + $0x1a8] sm:$0xff]  ;;  %v633_v33 = vpack.c.bf16 %v54_v28, %v53_v27  ;;  %v71_v35 = vld [vmem:[#allocation5 + $0xb0] sm:$0xff] }
  0x2e   :  { %660 = vmatprep.subr.bf16.mxu1 %v659_v21  ;;  %v85_v31 = vld [vmem:[#allocation5 + $0x120] sm:$0xff]  ;;  %v86_v32 = vld [vmem:[#allocation5 + $0x128] sm:$0xff]  ;;  %630 = vmatpush3.bf16.msra.mxu0 %v629_v17  ;;  %v663_v34 = vpack.c.bf16 %v102_v30, %v101_v29  ;;  %v72_v36 = vld [vmem:[#allocation5 + $0xb8] sm:$0xff] }
  0x2f   :  { %v55_v37 = vld [vmem:[#allocation5 + $0x30] sm:$0xff]  ;;  %632 = vmatprep.subr.bf16.mxu0 %v631_v26  ;;  %v665_v38 = vpack.c.bf16 %v86_v32, %v85_v31  ;;  %v635_v39 = vpack.c.bf16 %v72_v36, %v71_v35  ;;  %v56_v40 = vld [vmem:[#allocation5 + $0x38] sm:$0xff]  ;;  %v73_v46 = vld [vmem:[#allocation5 + $0xc0] sm:$0xff] }
  0x30   :  { %662 = vmatpush3.bf16.msra.mxu1 %v661_v25  ;;  %v103_v41 = vld [vmem:[#allocation5 + $0x1b0] sm:$0xff]  ;;  %v104_v42 = vld [vmem:[#allocation5 + $0x1b8] sm:$0xff]  ;;  %v74_v47 = vld [vmem:[#allocation5 + $0xc8] sm:$0xff]  ;;  %v637_v48 = vpack.c.bf16 %v56_v40, %v55_v37 }
  0x31   :  { %664 = vmatprep.subr.bf16.mxu1 %v663_v34  ;;  %v667_v43 = vpack.c.bf16 %v104_v42, %v103_v41  ;;  %v87_v44 = vld [vmem:[#allocation5 + $0x130] sm:$0xff]  ;;  %v88_v45 = vld [vmem:[#allocation5 + $0x138] sm:$0xff]  ;;  %v105_v49 = vld [vmem:[#allocation5 + $0x1c0] sm:$0xff]  ;;  %v639_v52 = vpack.c.bf16 %v74_v47, %v73_v46 }
  0x32   :  { %634 = vmatpush3.bf16.msra.mxu0 %v633_v33  ;;  %v106_v50 = vld [vmem:[#allocation5 + $0x1c8] sm:$0xff]  ;;  %v669_v51 = vpack.c.bf16 %v88_v45, %v87_v44  ;;  %v57_v53 = vld [vmem:[#allocation5 + $0x40] sm:$0xff]  ;;  %v75_v58 = vld [vmem:[#allocation5 + $0xd0] sm:$0xff] }
  0x33   :  { %636 = vmatprep.subr.bf16.mxu0 %v635_v39  ;;  %v58_v54 = vld [vmem:[#allocation5 + $0x48] sm:$0xff]  ;;  %v89_v55 = vld [vmem:[#allocation5 + $0x140] sm:$0xff]  ;;  %v671_v56 = vpack.c.bf16 %v106_v50, %v105_v49  ;;  %v76_v59 = vld [vmem:[#allocation5 + $0xd8] sm:$0xff] }
  0x34   :  { %666 = vmatpush3.bf16.msra.mxu1 %v665_v38  ;;  %v90_v57 = vld [vmem:[#allocation5 + $0x148] sm:$0xff]  ;;  %v107_v60 = vld [vmem:[#allocation5 + $0x1d0] sm:$0xff]  ;;  %v108_v61 = vld [vmem:[#allocation5 + $0x1d8] sm:$0xff]  ;;  %v641_v62 = vpack.c.bf16 %v58_v54, %v57_v53  ;;  %v643_v0 = vpack.c.bf16 %v76_v59, %v75_v58 }
  0x35   :  { %668 = vmatprep.subr.bf16.mxu1 %v667_v43  ;;  %v673_v63 = vpack.c.bf16 %v90_v57, %v89_v55  ;;  %v59_v1 = vld [vmem:[#allocation5 + $0x50] sm:$0xff]  ;;  %v60_v2 = vld [vmem:[#allocation5 + $0x58] sm:$0xff]  ;;  %v675_v4 = vpack.c.bf16 %v108_v61, %v107_v60  ;;  %v77_v6 = vld [vmem:[#allocation5 + $0xe0] sm:$0xff] }
  0x36   :  { %638 = vmatpush3.bf16.msra.mxu0 %v637_v48  ;;  %v91_v3 = vld [vmem:[#allocation5 + $0x150] sm:$0xff]  ;;  %v92_v5 = vld [vmem:[#allocation5 + $0x158] sm:$0xff]  ;;  %v78_v7 = vld [vmem:[#allocation5 + $0xe8] sm:$0xff]  ;;  %v645_v10 = vpack.c.bf16 %v60_v2, %v59_v1 }
  0x37   :  { %640 = vmatprep.subr.bf16.mxu0 %v639_v52  ;;  %v109_v8 = vld [vmem:[#allocation5 + $0x1e0] sm:$0xff]  ;;  %v110_v9 = vld [vmem:[#allocation5 + $0x1e8] sm:$0xff]  ;;  %v677_v13 = vpack.c.bf16 %v92_v5, %v91_v3  ;;  %v647_v14 = vpack.c.bf16 %v78_v7, %v77_v6  ;;  %v79_v19 = vld [vmem:[#allocation5 + $0xf0] sm:$0xff] }
  0x38   :  { %670 = vmatpush3.bf16.msra.mxu1 %v669_v51  ;;  %v61_v11 = vld [vmem:[#allocation5 + $0x60] sm:$0xff]  ;;  %v62_v12 = vld [vmem:[#allocation5 + $0x68] sm:$0xff]  ;;  %v679_v18 = vpack.c.bf16 %v110_v9, %v109_v8  ;;  %v80_v20 = vld [vmem:[#allocation5 + $0xf8] sm:$0xff] }
  0x39   :  { %672 = vmatprep.subr.bf16.mxu1 %v671_v56  ;;  %v93_v15 = vld [vmem:[#allocation5 + $0x160] sm:$0xff]  ;;  %v94_v16 = vld [vmem:[#allocation5 + $0x168] sm:$0xff]  ;;  %v44_v21 = vld [vmem:[#allocation2 + $0x18] sm:$0xff]  ;;  %v649_v24 = vpack.c.bf16 %v62_v12, %v61_v11  ;;  %v651_v26 = vpack.c.bf16 %v80_v20, %v79_v19 }
  0x3a   :  { %642 = vmatpush3.bf16.msra.mxu0 %v641_v62  ;;  %v42_v17 = vld [vmem:[#allocation2 + $0x8] sm:$0xff]  ;;  %v111_v22 = vld [vmem:[#allocation5 + $0x1f0] sm:$0xff]  ;;  %v112_v23 = vld [vmem:[#allocation5 + $0x1f8] sm:$0xff]  ;;  %318 = vmatprep.mubr.f32.mxu1 %v44_v21  ;;  %v681_v25 = vpack.c.bf16 %v94_v16, %v93_v15 }
  0x3b   :  { %644 = vmatprep.subr.bf16.mxu0 %v643_v0  ;;  %248 = vmatprep.mubr.f32.mxu0 %v42_v17  ;;  %v63_v27 = vld [vmem:[#allocation5 + $0x70] sm:$0xff]  ;;  %v64_v28 = vld [vmem:[#allocation5 + $0x78] sm:$0xff]  ;;  %v683_v30 = vpack.c.bf16 %v112_v23, %v111_v22  ;;  %v129_v32 = vld [vmem:[#allocation5 + $0x280] sm:$0xff] }
  0x3c   :  { %674 = vmatpush3.bf16.msra.mxu1 %v673_v63  ;;  %v95_v29 = vld [vmem:[#allocation5 + $0x170] sm:$0xff]  ;;  %v96_v31 = vld [vmem:[#allocation5 + $0x178] sm:$0xff]  ;;  %v130_v33 = vld [vmem:[#allocation5 + $0x288] sm:$0xff]  ;;  %v653_v36 = vpack.c.bf16 %v64_v28, %v63_v27 }
  0x3d   :  { %676 = vmatprep.subr.bf16.mxu1 %v675_v4  ;;  %v161_v34 = vld [vmem:[#allocation5 + $0x380] sm:$0xff]  ;;  %v162_v35 = vld [vmem:[#allocation5 + $0x388] sm:$0xff]  ;;  %v685_v37 = vpack.c.bf16 %v96_v31, %v95_v29  ;;  %v687_v38 = vpack.c.bf16 %v130_v33, %v129_v32  ;;  %v131_v44 = vld [vmem:[#allocation5 + $0x290] sm:$0xff] }
  0x3e   :  { %646 = vmatpush3.bf16.msra.mxu0 %v645_v10  ;;  %v113_v39 = vld [vmem:[#allocation5 + $0x200] sm:$0xff]  ;;  %v114_v40 = vld [vmem:[#allocation5 + $0x208] sm:$0xff]  ;;  %v719_v42 = vpack.c.bf16 %v162_v35, %v161_v34  ;;  %v132_v45 = vld [vmem:[#allocation5 + $0x298] sm:$0xff] }
  0x3f   :  { %648 = vmatprep.subr.bf16.mxu0 %v647_v14  ;;  %v145_v41 = vld [vmem:[#allocation5 + $0x300] sm:$0xff]  ;;  %v146_v43 = vld [vmem:[#allocation5 + $0x308] sm:$0xff]  ;;  %v163_v46 = vld [vmem:[#allocation5 + $0x390] sm:$0xff]  ;;  %v689_v49 = vpack.c.bf16 %v114_v40, %v113_v39  ;;  %v691_v52 = vpack.c.bf16 %v132_v45, %v131_v44 }
  0x40   :  { %678 = vmatpush3.bf16.msra.mxu1 %v677_v13  ;;  %v164_v47 = vld [vmem:[#allocation5 + $0x398] sm:$0xff]  ;;  %v41_v48 = vld [vmem:[#allocation2] sm:$0xff]  ;;  %v43_v50 = vld [vmem:[#allocation2 + $0x10] sm:$0xff]  ;;  %v721_v51 = vpack.c.bf16 %v146_v43, %v145_v41 }
  0x41   :  { %680 = vmatprep.subr.bf16.mxu1 %v679_v18  ;;  %v115_v53 = vld [vmem:[#allocation5 + $0x210] sm:$0xff]  ;;  %v116_v54 = vld [vmem:[#allocation5 + $0x218] sm:$0xff]  ;;  %v723_v56 = vpack.c.bf16 %v164_v47, %v163_v46  ;;  %v133_v58 = vld [vmem:[#allocation5 + $0x2a0] sm:$0xff] }
  0x42   :  { %650 = vmatpush3.bf16.msra.mxu0 %v649_v24  ;;  %v147_v55 = vld [vmem:[#allocation5 + $0x310] sm:$0xff]  ;;  %v148_v57 = vld [vmem:[#allocation5 + $0x318] sm:$0xff]  ;;  %v134_v59 = vld [vmem:[#allocation5 + $0x2a8] sm:$0xff]  ;;  %v693_v62 = vpack.c.bf16 %v116_v54, %v115_v53 }
  0x43   :  { %652 = vmatprep.subr.bf16.mxu0 %v651_v26  ;;  %v165_v60 = vld [vmem:[#allocation5 + $0x3a0] sm:$0xff]  ;;  %v166_v61 = vld [vmem:[#allocation5 + $0x3a8] sm:$0xff]  ;;  %v725_v63 = vpack.c.bf16 %v148_v57, %v147_v55  ;;  %v695_v0 = vpack.c.bf16 %v134_v59, %v133_v58  ;;  %v135_v6 = vld [vmem:[#allocation5 + $0x2b0] sm:$0xff] }
  0x44   :  { %682 = vmatpush3.bf16.msra.mxu1 %v681_v25  ;;  %v117_v1 = vld [vmem:[#allocation5 + $0x220] sm:$0xff]  ;;  %v118_v2 = vld [vmem:[#allocation5 + $0x228] sm:$0xff]  ;;  %v727_v4 = vpack.c.bf16 %v166_v61, %v165_v60  ;;  %v136_v7 = vld [vmem:[#allocation5 + $0x2b8] sm:$0xff] }
  0x45   :  { %684 = vmatprep.subr.bf16.mxu1 %v683_v30  ;;  %v149_v3 = vld [vmem:[#allocation5 + $0x320] sm:$0xff]  ;;  %v150_v5 = vld [vmem:[#allocation5 + $0x328] sm:$0xff]  ;;  %v167_v8 = vld [vmem:[#allocation5 + $0x3b0] sm:$0xff]  ;;  %v697_v10 = vpack.c.bf16 %v118_v2, %v117_v1  ;;  %v699_v12 = vpack.c.bf16 %v136_v7, %v135_v6 }
  0x46   :  { %654 = vmatpush3.bf16.msra.mxu0 %v653_v36  ;;  %v168_v9 = vld [vmem:[#allocation5 + $0x3b8] sm:$0xff]  ;;  %v729_v11 = vpack.c.bf16 %v150_v5, %v149_v3  ;;  %v119_v13 = vld [vmem:[#allocation5 + $0x230] sm:$0xff]  ;;  %v137_v18 = vld [vmem:[#allocation5 + $0x2c0] sm:$0xff] }
  0x47   :  { %688 = vmatprep.subr.bf16.mxu0 %v687_v38  ;;  %v120_v14 = vld [vmem:[#allocation5 + $0x238] sm:$0xff]  ;;  %v151_v15 = vld [vmem:[#allocation5 + $0x330] sm:$0xff]  ;;  %v731_v16 = vpack.c.bf16 %v168_v9, %v167_v8  ;;  %v138_v19 = vld [vmem:[#allocation5 + $0x2c8] sm:$0xff] }
  0x48   :  { %686 = vmatpush3.bf16.msra.mxu1 %v685_v37  ;;  %v152_v17 = vld [vmem:[#allocation5 + $0x338] sm:$0xff]  ;;  %v169_v20 = vld [vmem:[#allocation5 + $0x3c0] sm:$0xff]  ;;  %v170_v21 = vld [vmem:[#allocation5 + $0x3c8] sm:$0xff]  ;;  %v701_v22 = vpack.c.bf16 %v120_v14, %v119_v13  ;;  %v703_v26 = vpack.c.bf16 %v138_v19, %v137_v18 }
  0x49   :  { %720 = vmatprep.subr.bf16.mxu1 %v719_v42  ;;  %249 = vmatmul.mubr.f32.vlgmr.msra.gmra.mrb[0].mxu0 %v41_v48  ;;  %v46_v23 = vld [vmem:[#allocation2 + $0x28] sm:$0xff]  ;;  %v48_v24 = vld [vmem:[#allocation2 + $0x38] sm:$0xff]  ;;  %v733_v25 = vpack.c.bf16 %v152_v17, %v151_v15  ;;  %v121_v27 = vld [vmem:[#allocation5 + $0x240] sm:$0xff]  ;;  %v735_v30 = vpack.c.bf16 %v170_v21, %v169_v20 }
  0x4a   :  { %690 = vmatpush3.bf16.msra.mxu0 %v689_v49  ;;  %v122_v28 = vld [vmem:[#allocation5 + $0x248] sm:$0xff]  ;;  %v153_v29 = vld [vmem:[#allocation5 + $0x340] sm:$0xff]  ;;  %v139_v32 = vld [vmem:[#allocation5 + $0x2d0] sm:$0xff]  ;;  %388 = vmatprep.mubr.f32.mxu0 %v46_v23 }
  0x4b   :  { %319 = vmatmul.mubr.f32.vlgmr.msra.gmra.mrb[0].mxu1 %v43_v50  ;;  %692 = vmatprep.subr.bf16.mxu0 %v691_v52  ;;  %v154_v31 = vld [vmem:[#allocation5 + $0x348] sm:$0xff]  ;;  %v140_v33 = vld [vmem:[#allocation5 + $0x2d8] sm:$0xff]  ;;  %v171_v34 = vld [vmem:[#allocation5 + $0x3d0] sm:$0xff]  ;;  %v705_v36 = vpack.c.bf16 %v122_v28, %v121_v27 }
  0x4c   :  { %722 = vmatpush3.bf16.msra.mxu1 %v721_v51  ;;  %v172_v35 = vld [vmem:[#allocation5 + $0x3d8] sm:$0xff]  ;;  %458 = vmatprep.mubr.f32.mxu1 %v48_v24  ;;  %v737_v37 = vpack.c.bf16 %v154_v31, %v153_v29  ;;  %v707_v38 = vpack.c.bf16 %v140_v33, %v139_v32  ;;  %v123_v39 = vld [vmem:[#allocation5 + $0x250] sm:$0xff]  ;;  %v141_v44 = vld [vmem:[#allocation5 + $0x2e0] sm:$0xff] }
  0x4d   :  { %724 = vmatprep.subr.bf16.mxu1 %v723_v56  ;;  %v124_v40 = vld [vmem:[#allocation5 + $0x258] sm:$0xff]  ;;  %v155_v41 = vld [vmem:[#allocation5 + $0x350] sm:$0xff]  ;;  %v739_v42 = vpack.c.bf16 %v172_v35, %v171_v34  ;;  %v142_v45 = vld [vmem:[#allocation5 + $0x2e8] sm:$0xff] }
  0x4e   :  { %694 = vmatpush3.bf16.msra.mxu0 %v693_v62  ;;  %v156_v43 = vld [vmem:[#allocation5 + $0x358] sm:$0xff]  ;;  %v173_v46 = vld [vmem:[#allocation5 + $0x3e0] sm:$0xff]  ;;  %v174_v47 = vld [vmem:[#allocation5 + $0x3e8] sm:$0xff]  ;;  %v709_v48 = vpack.c.bf16 %v124_v40, %v123_v39  ;;  %v711_v50 = vpack.c.bf16 %v142_v45, %v141_v44 }
  0x4f   :  { %696 = vmatprep.subr.bf16.mxu0 %v695_v0  ;;  %v741_v49 = vpack.c.bf16 %v156_v43, %v155_v41  ;;  %v125_v51 = vld [vmem:[#allocation5 + $0x260] sm:$0xff]  ;;  %v126_v52 = vld [vmem:[#allocation5 + $0x268] sm:$0xff]  ;;  %v743_v54 = vpack.c.bf16 %v174_v47, %v173_v46  ;;  %v143_v56 = vld [vmem:[#allocation5 + $0x2f0] sm:$0xff] }
  0x50   :  { %726 = vmatpush3.bf16.msra.mxu1 %v725_v63  ;;  %v157_v53 = vld [vmem:[#allocation5 + $0x360] sm:$0xff]  ;;  %v158_v55 = vld [vmem:[#allocation5 + $0x368] sm:$0xff]  ;;  %v144_v57 = vld [vmem:[#allocation5 + $0x2f8] sm:$0xff]  ;;  %v713_v60 = vpack.c.bf16 %v126_v52, %v125_v51 }
  0x51   :  { %728 = vmatprep.subr.bf16.mxu1 %v727_v4  ;;  %v175_v58 = vld [vmem:[#allocation5 + $0x3f0] sm:$0xff]  ;;  %v176_v59 = vld [vmem:[#allocation5 + $0x3f8] sm:$0xff]  ;;  %v745_v61 = vpack.c.bf16 %v158_v55, %v157_v53  ;;  %v715_v62 = vpack.c.bf16 %v144_v57, %v143_v56  ;;  %v45_v6 = vld [vmem:[#allocation2 + $0x20] sm:$0xff] }
  0x52   :  { %698 = vmatpush3.bf16.msra.mxu0 %v697_v10  ;;  %v127_v63 = vld [vmem:[#allocation5 + $0x270] sm:$0xff]  ;;  %v128_v0 = vld [vmem:[#allocation5 + $0x278] sm:$0xff]  ;;  %v747_v1 = vpack.c.bf16 %v176_v59, %v175_v58  ;;  %v482_v9 = vld [vmem:[%s901_s2] ss:$0 sm:$0xff]  ;;  %s800_s2 = scalar_lea.vmem %s473_s12, 128 }
  0x53   :  { %700 = vmatprep.subr.bf16.mxu0 %v699_v12  ;;  %v159_v2 = vld [vmem:[#allocation5 + $0x370] sm:$0xff]  ;;  %v160_v3 = vld [vmem:[#allocation5 + $0x378] sm:$0xff]  ;;  %v717_v4 = vpack.c.bf16 %v128_v0, %v127_v63  ;;  %p801_p2 = scmp.ne.s32.totalorder %s473_s12, %s800_s2  ;;  %p806_p4 = scmp.lt.s32.totalorder %s800_s2, %s800_s2 }
  0x54   :  { %730 = vmatpush3.bf16.msra.mxu1 %v729_v11  ;;  %v749_v5 = vpack.c.bf16 %v160_v3, %v159_v2  ;;  %v47_v7 = vld [vmem:[#allocation2 + $0x30] sm:$0xff] }
  0x55   :  { %732 = vmatprep.subr.bf16.mxu1 %v731_v16  ;;  %p807_p5 = por %p806_p4, %p805_p3 }
  0x56   :  { %702 = vmatpush3.bf16.msra.mxu0 %v701_v22 }
  0x57   :  { %704 = vmatprep.subr.bf16.mxu0 %v703_v26  ;;  %p808_p6 = pnand %p807_p5, %p801_p2 }
  0x58   :  { %734 = vmatpush3.bf16.msra.mxu1 %v733_v25 }
  0x59   :  { %736 = vmatprep.subr.bf16.mxu1 %v735_v30 }
  0x5a   :  { %706 = vmatpush3.bf16.msra.mxu0 %v705_v36 }
  0x5b   :  { %708 = vmatprep.subr.bf16.mxu0 %v707_v38 }
  0x5c   :  { %738 = vmatpush3.bf16.msra.mxu1 %v737_v37 }
  0x5d   :  { %740 = vmatprep.subr.bf16.mxu1 %v739_v42 }
  0x5e   :  { %710 = vmatpush3.bf16.msra.mxu0 %v709_v48 }
  0x5f   :  { %712 = vmatprep.subr.bf16.mxu0 %v711_v50 }
  0x60   :  { %742 = vmatpush3.bf16.msra.mxu1 %v741_v49 }
  0x61   :  { %744 = vmatprep.subr.bf16.mxu1 %v743_v54 }
  0x62   :  { %714 = vmatpush3.bf16.msra.mxu0 %v713_v60 }
  0x63   :  { %716 = vmatprep.subr.bf16.mxu0 %v715_v62 }
  0x64   :  { %746 = vmatpush3.bf16.msra.mxu1 %v745_v61 }
  0x65   :  { %748 = vmatprep.subr.bf16.mxu1 %v747_v1 }
  0x66   :  { %718 = vmatpush3.bf16.msra.mxu0 %v717_v4 }
  0x68   :  { %750 = vmatpush3.bf16.msra.mxu1 %v749_v5 }
  0x69   :  { %389 = vmatmul.mubr.f32.vlgmr.msra.gmra.mrb[2].mxu0 %v45_v6 }
  0x6b   :  { %459 = vmatmul.mubr.f32.vlgmr.msra.gmra.mrb[2].mxu1 %v47_v7 }
 0x11c   :  { %v515_v8 = vpop.f32.mrb[0].mxu0 }
 0x11d   :  { %v516_v10 = vpop.f32.mrb[1].mxu0 }
 0x11e   :  { %v550_v11 = vpop.f32.mrb[0].mxu1  ;;  %v517_v12 = vadd.f32 %v516_v10, %v515_v8 }
 0x11f   :  { %v551_v13 = vpop.f32.mrb[1].mxu1 }
 0x120   :  { %v552_v14 = vadd.f32 %v551_v13, %v550_v11  ;;  %v251_v15 = vadd.f32 %v517_v12, %v482_v9 }
 0x122   :  { %v321_v16 = vadd.f32 %v552_v14, %v251_v15 }
 0x13c   :  { %v585_v17 = vpop.f32.mrb[2].mxu0 }
 0x13d   :  { %v586_v18 = vpop.f32.mrb[3].mxu0 }
 0x13e   :  { %v620_v19 = vpop.f32.mrb[2].mxu1  ;;  %v587_v20 = vadd.f32 %v586_v18, %v585_v17 }
 0x13f   :  { %v621_v21 = vpop.f32.mrb[3].mxu1 }
 0x140   :  { %v622_v22 = vadd.f32 %v621_v21, %v620_v19  ;;  %v391_v23 = vadd.f32 %v587_v20, %v321_v16 }
 0x142   :  { %v461_v24 = vadd.f32 %v622_v22, %v391_v23 }
 0x144   :  { %v464_v25 = vmax.f32 %v461_v24, 0.0 }
 0x146   :  { %465 = vst [vmem:[#allocation7] sm:$0xff] %v464_v25 }
 0x147   :  { %811 = shalt.err (!%p808_p6)
}
 0x148   :  { %s812_s15 = scalar_lea.hbm %s902_s3, 128 }
 0x149   :  { %p813_p7 = scmp.ne.s32.totalorder %s902_s3, %s812_s15  ;;  %p816_p8 = scmp.lt.u32.totalorder %s812_s15, %s902_s3 }
 0x14b   :  { %p818_p9 = pnand %p816_p8, %p813_p7 }
 0x14d   :  { %821 = shalt.err (!%p818_p9)
}
 0x14e   :  { %475 = dma.vmem_to_hbm [thread:$0]  %s473_s12, 128, %s902_s3, [#allocation4]  }
 0x14f   :  { %826 = dma.done.wait [#allocation4], 128  }
 0x150   :  { %827 = vsyncadd [#allocation4], 4294967168 }
 0x151   :  { %479 = vsyncpa [#allocation3], 1 }
 0x152   :  { %480 = vsyncpa [#allocation6], 1 }
 0x153   :  { %481 = vsyncpa [#allocation4], 1 }

</bundles_post_ra>
